<compile_context>
chip_gen: v7x
topology: tpu7x:2x2x1
jax: 0.10.0
libtpu: 0.0.40
codegen_flags: <defaults>
</compile_context>

<pallas_src>
import jax
import jax.numpy as jnp
from jax.experimental import pallas as pl
from jax.experimental.pallas import tpu as pltpu


# ----------------------------------------------------------------------------
# Utilities
# ----------------------------------------------------------------------------
def _round_up(x, m):
    return ((x + m - 1) // m) * m


def _min_grid_blocks():
    """>= 2 grid blocks on multi-TensorCore chips (v7x) so both cores get work;
    1 block (minimal sequential steps) on single-TC v5e/v6e."""
    try:
        kind = jax.devices()[0].device_kind.lower()
    except Exception:
        return 1
    return 2 if ("v7" in kind or "7x" in kind) else 1


_MIN_BLOCKS = _min_grid_blocks()
_TP_MAX = 8192   # (4 + 64 + 48) rows * 8192 lanes * 4 B ~= 3.6 MB live -> far below VMEM


# ----------------------------------------------------------------------------
# Fused kernel: relu(W2big @ relu(W1t @ x + b1) + b2), pixels on lanes.
# ----------------------------------------------------------------------------
def _fused_decoder_kernel(x_ref, w1_ref, b1_ref, w2_ref, b2_ref, o_ref):
    # x_ref : (Cin, TP)           input pixels, channel-major, flat (n,h,w) lane axis
    # w1_ref: (4*Cmid, Cin)       rows = (kh1, kw1, c1)
    # b1_ref: (4*Cmid, 1)
    # w2_ref: (16*Cout, 4*Cmid)   block-diagonal kron(I4, W2t); rows = (kh1,kw1,kh2,kw2,c2)
    # b2_ref: (16*Cout, 1)
    # o_ref : (16*Cout, TP)       lane-dense output block
    a1 = jnp.dot(w1_ref[...], x_ref[...], preferred_element_type=jnp.float32)
    a1 = jnp.maximum(a1 + b1_ref[...], 0.0)                       # (64, TP), stays in VMEM
    a2 = jnp.dot(w2_ref[...], a1, preferred_element_type=jnp.float32)
    o_ref[...] = jnp.maximum(a2 + b2_ref[...], 0.0).astype(o_ref.dtype)


# ----------------------------------------------------------------------------
# One-time (model-init) weight repacking — hoisted out of the hot path.
# ----------------------------------------------------------------------------
def prepare_decoder_params(w1, b1, w2, b2):
    """Repack PyTorch-layout ConvTranspose2d params once; pass results to the forward."""
    Cin, Cmid = w1.shape[0], w1.shape[1]
    Cout = w2.shape[1]
    assert w1.shape == (Cin, Cmid, 2, 2) and w2.shape == (Cmid, Cout, 2, 2)
    # layer 1: rows = (kh1, kw1, c1), cols = ci
    w1t = jnp.transpose(w1, (2, 3, 1, 0)).reshape(4 * Cmid, Cin)
    b1c = jnp.tile(b1, 4).reshape(4 * Cmid, 1)
    # layer 2: rows = (kh2, kw2, c2), cols = c1; block-diagonal over patch p1 = (kh1, kw1)
    w2t = jnp.transpose(w2, (2, 3, 1, 0)).reshape(4 * Cout, Cmid)
    w2big = jnp.kron(jnp.eye(4, dtype=w2t.dtype), w2t)            # (16*Cout, 4*Cmid)
    b2c = jnp.tile(b2, 16).reshape(16 * Cout, 1)
    return w1t, b1c, w2big, b2c


# ----------------------------------------------------------------------------
# Decoder forward (hot path): one pallas_call + one output pixel shuffle.
# ----------------------------------------------------------------------------
@jax.jit
def cheeho_decoder_forward(z, w1t, b1c, w2big, b2c):
    """z: (N, 4, H, W) NCHW  ->  (N, 3, 4H, 4W) NCHW (matches PyTorch CheeHoDecoder)."""
    N, Cin, H, W = z.shape
    R4, Cin_w = w1t.shape            # (4*Cmid, Cin) = (64, 4)
    R = w2big.shape[0]               # 16*Cout = 48
    Cout = R // 16
    assert Cin_w == Cin

    # ---- pixel-axis tiling: batch folded into lanes, minimal step count ----
    P = N * H * W
    nblocks = max(_MIN_BLOCKS, pl.cdiv(P, _TP_MAX))
    TP = _round_up(pl.cdiv(P, nblocks), 128)     # lane-dense tile, bounded tail padding
    nblocks = max(_MIN_BLOCKS, pl.cdiv(P, TP))
    Pp = nblocks * TP

    # channel-major over the flat (n, h, w) pixel axis (tiny copy: Cin = 4 rows)
    x = jnp.transpose(z.reshape(N, Cin, H * W), (1, 0, 2)).reshape(Cin, P)
    if Pp != P:
        x = jnp.pad(x, ((0, 0), (0, Pp - P)))

    out = pl.pallas_call(
        _fused_decoder_kernel,
        out_shape=jax.ShapeDtypeStruct((R, Pp), z.dtype),
        grid=(nblocks,),
        in_specs=[
            pl.BlockSpec((Cin, TP), lambda j: (0, j)),     # x tile (pixels on lanes)
            pl.BlockSpec((R4, Cin), lambda j: (0, 0)),     # W1t   (resident)
            pl.BlockSpec((R4, 1), lambda j: (0, 0)),       # b1
            pl.BlockSpec((R, R4), lambda j: (0, 0)),       # W2big (resident)
            pl.BlockSpec((R, 1), lambda j: (0, 0)),        # b2
        ],
        out_specs=pl.BlockSpec((R, TP), lambda j: (0, j)),  # lane-dense (48, TP) store
        compiler_params=pltpu.CompilerParams(
            dimension_semantics=("parallel",)),
    )(x, w1t, b1c, w2big, b2c)

    # ---- single combined pixel shuffle to NCHW ----
    # rows: (kh1, kw1, kh2, kw2, c2); cols: (n, h, w)
    # out[n, c2, 4h + 2*kh1 + kh2, 4w + 2*kw1 + kw2]
    # NOTE: padded lanes hold relu(bias) garbage — the [:, :P] slice discards them.
    # If a consumer accepts the channel-major (R, P) layout, this extra pass over
    # the dominant output bytes can be skipped entirely.
    out = out[:, :P].reshape(2, 2, 2, 2, Cout, N, H, W)
    out = jnp.transpose(out, (5, 4, 6, 0, 2, 7, 1, 3))      # (n,c2,h,kh1,kh2,w,kw1,kw2)
    return out.reshape(N, Cout, 4 * H, 4 * W)


# ----------------------------------------------------------------------------
# Pure-JAX reference (exact ConvTranspose2d semantics for k = s = 2)
# ----------------------------------------------------------------------------
def _ref_deconv(x_nchw, w, b):
    p = jnp.einsum("nchw,cokl->nohwkl", x_nchw, w) + b[None, :, None, None, None, None]
    N, Co, H, W, _, _ = p.shape
    return jnp.transpose(p, (0, 1, 2, 4, 3, 5)).reshape(N, Co, 2 * H, 2 * W)


def _ref_forward(z, w1, b1, w2, b2):
    r = jax.nn.relu(_ref_deconv(z, w1, b1))
    return jax.nn.relu(_ref_deconv(r, w2, b2))


if __name__ == "__main__":
    key = jax.random.PRNGKey(0)
    k_z, k_w1, k_b1, k_w2, k_b2 = jax.random.split(key, 5)

    # Deterministic synthetic parameters (shapes from the nn.ConvTranspose2d defs).
    w1 = jax.random.normal(k_w1, (4, 16, 2, 2), dtype=jnp.float32) * 0.2
    b1 = jax.random.normal(k_b1, (16,), dtype=jnp.float32) * 0.1
    w2 = jax.random.normal(k_w2, (16, 3, 2, 2), dtype=jnp.float32) * 0.2
    b2 = jax.random.normal(k_b2, (3,), dtype=jnp.float32) * 0.1

    # Input latent: batch=2, channels=4, spatial=16x16.
    z = jax.random.normal(k_z, (2, 4, 16, 16), dtype=jnp.float32)

    # One-time param repack (model init) — kept OUT of the jitted hot path.
    params = jax.block_until_ready(prepare_decoder_params(w1, b1, w2, b2))

    out = cheeho_decoder_forward(z, *params)
    out = jax.block_until_ready(out)
    assert out.shape == (2, 3, 64, 64), out.shape

    ref = _ref_forward(z, w1, b1, w2, b2)
    assert jnp.allclose(out, ref, atol=1e-4, rtol=1e-4), (
        float(jnp.max(jnp.abs(out - ref)))
    )

    print("KERNEL_OK")
</pallas_src>

<mosaic_0001>
module attributes {stable_mosaic.version = 11 : i64} {
  func.func @_fused_decoder_kernel(%arg0: i32, %arg1: memref<4x512xf32, #tpu.memory_space<vmem>>, %arg2: memref<64x4xf32, #tpu.memory_space<vmem>>, %arg3: memref<64x1xf32, #tpu.memory_space<vmem>>, %arg4: memref<48x64xf32, #tpu.memory_space<vmem>>, %arg5: memref<48x1xf32, #tpu.memory_space<vmem>>, %arg6: memref<48x512xf32, #tpu.memory_space<vmem>>) attributes {dimension_semantics = [#tpu.dimension_semantics<parallel>], iteration_bounds = array<i64: 1>, scalar_prefetch = 0 : i64, scratch_operands = 0 : i64, tpu.core_type = #tpu.core_type<tc>, window_params = [{transform_indices = @transform_0, window_bounds = array<i64: 4, 512>}, {pipeline_mode = #tpu.pipeline_mode<synchronous>, transform_indices = @transform_1, window_bounds = array<i64: 64, 4>}, {pipeline_mode = #tpu.pipeline_mode<synchronous>, transform_indices = @transform_2, window_bounds = array<i64: 64, 1>}, {pipeline_mode = #tpu.pipeline_mode<synchronous>, transform_indices = @transform_3, window_bounds = array<i64: 48, 64>}, {pipeline_mode = #tpu.pipeline_mode<synchronous>, transform_indices = @transform_4, window_bounds = array<i64: 48, 1>}, {transform_indices = @transform_5, window_bounds = array<i64: 48, 512>}]} {
    %c0 = arith.constant 0 : index
    %c0_0 = arith.constant 0 : index
    %0 = vector.load %arg2[%c0, %c0_0] : memref<64x4xf32, #tpu.memory_space<vmem>>, vector<64x4xf32>
    %c0_1 = arith.constant 0 : index
    %c0_2 = arith.constant 0 : index
    %1 = vector.load %arg1[%c0_1, %c0_2] : memref<4x512xf32, #tpu.memory_space<vmem>>, vector<4x512xf32>
    %cst = arith.constant dense<0.000000e+00> : vector<64x512xf32>
    %2 = tpu.matmul %0, %1, %cst {dimension_numbers = #tpu.dot_dimension_numbers<[1], [0], [0], [1], [0, 0, 1, 1], [], []>} : vector<64x4xf32>, vector<4x512xf32>, vector<64x512xf32> -> vector<64x512xf32>
    %c0_3 = arith.constant 0 : index
    %c0_4 = arith.constant 0 : index
    %3 = vector.load %arg3[%c0_3, %c0_4] : memref<64x1xf32, #tpu.memory_space<vmem>>, vector<64x1xf32>
    %4 = vector.broadcast %3 : vector<64x1xf32> to vector<64x512xf32>
    %5 = arith.addf %2, %4 : vector<64x512xf32>
    %cst_5 = arith.constant 0.000000e+00 : f32
    %6 = vector.broadcast %cst_5 : f32 to vector<64x512xf32>
    %7 = arith.maximumf %5, %6 : vector<64x512xf32>
    %c0_6 = arith.constant 0 : index
    %c0_7 = arith.constant 0 : index
    %8 = vector.load %arg4[%c0_6, %c0_7] : memref<48x64xf32, #tpu.memory_space<vmem>>, vector<48x64xf32>
    %cst_8 = arith.constant dense<0.000000e+00> : vector<48x512xf32>
    %9 = tpu.matmul %8, %7, %cst_8 {dimension_numbers = #tpu.dot_dimension_numbers<[1], [0], [0], [1], [0, 0, 1, 1], [], []>} : vector<48x64xf32>, vector<64x512xf32>, vector<48x512xf32> -> vector<48x512xf32>
    %c0_9 = arith.constant 0 : index
    %c0_10 = arith.constant 0 : index
    %10 = vector.load %arg5[%c0_9, %c0_10] : memref<48x1xf32, #tpu.memory_space<vmem>>, vector<48x1xf32>
    %11 = vector.broadcast %10 : vector<48x1xf32> to vector<48x512xf32>
    %12 = arith.addf %9, %11 : vector<48x512xf32>
    %cst_11 = arith.constant 0.000000e+00 : f32
    %13 = vector.broadcast %cst_11 : f32 to vector<48x512xf32>
    %14 = arith.maximumf %12, %13 : vector<48x512xf32>
    %c0_12 = arith.constant 0 : index
    %c0_13 = arith.constant 0 : index
    %15 = vector.load %arg6[%c0_12, %c0_13] : memref<48x512xf32, #tpu.memory_space<vmem>>, vector<48x512xf32>
    tpu.vector_store %arg6[%c0_12, %c0_13], %14 {strides = array<i32>} : memref<48x512xf32, #tpu.memory_space<vmem>>, vector<48x512xf32>,
    return
  }
  func.func @transform_0(%arg0: i32) -> (i32, i32) {
    %c0_i32 = arith.constant 0 : i32
    %c0_i32_0 = arith.constant 0 : i32
    return %c0_i32, %arg0 : i32, i32
  }
  func.func @transform_1(%arg0: i32) -> (i32, i32) {
    %c0_i32 = arith.constant 0 : i32
    %c0_i32_0 = arith.constant 0 : i32
    %c0_i32_1 = arith.constant 0 : i32
    return %c0_i32, %c0_i32_0 : i32, i32
  }
  func.func @transform_2(%arg0: i32) -> (i32, i32) {
    %c0_i32 = arith.constant 0 : i32
    %c0_i32_0 = arith.constant 0 : i32
    %c0_i32_1 = arith.constant 0 : i32
    return %c0_i32, %c0_i32_0 : i32, i32
  }
  func.func @transform_3(%arg0: i32) -> (i32, i32) {
    %c0_i32 = arith.constant 0 : i32
    %c0_i32_0 = arith.constant 0 : i32
    %c0_i32_1 = arith.constant 0 : i32
    return %c0_i32, %c0_i32_0 : i32, i32
  }
  func.func @transform_4(%arg0: i32) -> (i32, i32) {
    %c0_i32 = arith.constant 0 : i32
    %c0_i32_0 = arith.constant 0 : i32
    %c0_i32_1 = arith.constant 0 : i32
    return %c0_i32, %c0_i32_0 : i32, i32
  }
  func.func @transform_5(%arg0: i32) -> (i32, i32) {
    %c0_i32 = arith.constant 0 : i32
    %c0_i32_0 = arith.constant 0 : i32
    return %c0_i32, %arg0 : i32, i32
  }
}

</mosaic_0001>

<bundles_post_ra>
// kernel: cheeho_decoder_forward.1
= control target key start
LH: loop header
LB: loop body
LE: loop exit
PB: predicated region body
PF: predicated region fallthrough
CT: control target
= control target key end

     0   :  { %10 = vsyncpa [#allocation3], 0  ;;  %s801_s18 = smov [#allocation2]   ;;  %s1048_s0 = inlined_call_operand.vmem [shape: f32[4,512], index: 0, kind: input, shape index: {}]   ;;  %s1049_s1 = inlined_call_operand.vmem [shape: f32[64,4], index: 1, kind: input, shape index: {}]   ;;  %s1050_s2 = inlined_call_operand.vmem [shape: f32[64,1], index: 2, kind: input, shape index: {}]   ;;  %s1051_s3 = inlined_call_operand.hbm [shape: f32[48,64], index: 3, kind: input, shape index: {}]   ;;  %s1052_s4 = inlined_call_operand.vmem [shape: f32[48,1], index: 4, kind: input, shape index: {}]   ;;  %s1053_s5 = inlined_call_operand.vmem [shape: f32[48,512], index: 5, kind: output, shape index: {}]  }
   0x1   :  { %s22_s19 = sshll.u32 %s801_s18, 4  ;;  %s777_s22 = scalar_lea.hbm %s1051_s3, 768  ;;  %s23_s19 = int_to_ptr.vmem [resolvable:$true] %s22_s19 }
   0x2   :  { %p778_p0 = scmp.ne.s32.totalorder %s1051_s3, %s777_s22  ;;  %p781_p1 = scmp.lt.u32.totalorder %s777_s22, %s1051_s3 }
   0x4   :  { %p783_p2 = pnand %p781_p1, %p778_p0 }
   0x6   :  { %786 = shalt.err (!%p783_p2)
}
   0x7   :  { %s787_s27 = scalar_lea.vmem %s23_s19, 768  ;;  %p792_p4 = scmp.lt.s32.totalorder %s23_s19, %s23_s19 }
   0x8   :  { %p788_p3 = scmp.ne.s32.totalorder %s23_s19, %s787_s27  ;;  %p793_p5 = scmp.lt.s32.totalorder %s787_s27, %s787_s27 }
   0xa   :  { %p794_p6 = por %p793_p5, %p792_p4 }
   0xc   :  { %p795_p7 = pnand %p794_p6, %p788_p3 }
   0xe   :  { %798 = shalt.err (!%p795_p7)
}
   0xf   :  { %s802_s28 = smov 128   ;;  %s803_s29 = smov 8  }
  0x10   :  { %28 = dma.hbm_to_vmem [thread:$0]  %s1051_s3, 768, %s23_s19, [#allocation3], %s802_s28, %s802_s28, %s803_s29  }
  0x11   :  { %799 = dma.done.wait [#allocation3], 768  }
  0x12   :  { %800 = vsyncadd [#allocation3], 4294966528  ;;  %v804_v0 = vmov 0.0   ;;  %v805_v1 = vmov 0   ;;  %v42_v2 = vld [vmem:[%s1048_s0] sm:$0xff]  ;;  %vm121_vm0 = vcmask 1043456  }
  0x13   :  { %194 = vmatprep.mubr.f32.mxu0 %v804_v0  ;;  %307 = vmatprep.mubr.f32.mxu1 %v804_v0  ;;  %v43_v3 = vld [vmem:[%s1048_s0 + $0x8] sm:$0xff]  ;;  %v94_v4 = vcombine.high %v42_v2, %v42_v2  ;;  %v34_v6 = vld [vmem:[%s1049_s1] sm:$0xff]  ;;  %vm96_vm1 = vcmask 31744   ;;  %v46_v8 = vld [vmem:[%s1050_s2 + $0x10] sm:$0xff]  ;;  %vm430_vm2 = vcmask 523264  }
  0x14   :  { %773 = vset.pattern.permute.xlu0 %v805_v1  ;;  %774 = vset.pattern.permute.xlu1 %v805_v1  ;;  %v95_v5 = vcombine.high %v43_v3, %v43_v3  ;;  %v44_v7 = vld [vmem:[%s1050_s2] sm:$0xff]  ;;  %v35_v9 = vld [vmem:[%s1049_s1 + $0x8] sm:$0xff]  ;;  %v47_v11 = vld [vmem:[%s1050_s2 + $0x18] sm:$0xff] }
  0x15   :  { %704 = vmatprep.subr.msk.mxu0 %vm121_vm0, %v94_v4  ;;  %54 = vperm.xlu0 %773, %v44_v7   ;;  %v45_v10 = vld [vmem:[%s1050_s2 + $0x8] sm:$0xff]  ;;  %v36_v12 = vld [vmem:[%s1049_s1 + $0x10] sm:$0xff]  ;;  %v48_v13 = vld [vmem:[%s1050_s2 + $0x20] sm:$0xff] }
  0x16   :  { %714 = vmatprep.subr.msk.mxu1 %vm121_vm0, %v95_v5  ;;  %705 = vmatpush1.msk.msra.mxu0 %vm121_vm0, %v42_v2  ;;  %v49_v14 = vld [vmem:[%s1050_s2 + $0x28] sm:$0xff]  ;;  %v37_v15 = vld [vmem:[%s1049_s1 + $0x18] sm:$0xff]  ;;  %v50_v16 = vld [vmem:[%s1050_s2 + $0x30] sm:$0xff] }
  0x17   :  { %715 = vmatpush1.msk.msra.mxu1 %vm121_vm0, %v43_v3  ;;  %706 = vmatmul.mubr.msk.f32.vlgmr.msra.gmra.mrb[0].mxu0 %vm96_vm1, %v34_v6  ;;  %v51_v17 = vld [vmem:[%s1050_s2 + $0x38] sm:$0xff]  ;;  %v38_v18 = vld [vmem:[%s1049_s1 + $0x20] sm:$0xff]  ;;  %v395_v20 = vld [vmem:[%s1052_s4 + $0x8] sm:$0xff] }
  0x18   :  { %716 = vmatmul.mubr.msk.f32.vlgmr.msra.gmra.mrb[0].mxu1 %vm96_vm1, %v34_v6  ;;  %200 = vmatprep.mubr.f32.mxu0 %v804_v0  ;;  %v394_v19 = vld [vmem:[%s1052_s4] sm:$0xff]  ;;  %v39_v21 = vld [vmem:[%s1049_s1 + $0x28] sm:$0xff]  ;;  %v396_v22 = vld [vmem:[%s1052_s4 + $0x10] sm:$0xff] }
  0x19   :  { %313 = vmatprep.mubr.f32.mxu1 %v804_v0  ;;  %64 = vperm.xlu1 %774, %v46_v8   ;;  %v397_v23 = vld [vmem:[%s1052_s4 + $0x18] sm:$0xff]  ;;  %v40_v24 = vld [vmem:[%s1049_s1 + $0x30] sm:$0xff]  ;;  %v398_v25 = vld [vmem:[%s1052_s4 + $0x20] sm:$0xff] }
  0x1a   :  { %59 = vperm.xlu0 %773, %v45_v10   ;;  %v399_v26 = vld [vmem:[%s1052_s4 + $0x28] sm:$0xff]  ;;  %v41_v27 = vld [vmem:[%s1049_s1 + $0x38] sm:$0xff] }
  0x1b   :  { %707 = vmatmul.mubr.msk.f32.gmra.mrb[2].mxu0 %vm96_vm1, %v35_v9 }
  0x1c   :  { %717 = vmatmul.mubr.msk.f32.gmra.mrb[2].mxu1 %vm96_vm1, %v35_v9  ;;  %206 = vmatprep.mubr.f32.mxu0 %v804_v0 }
  0x1d   :  { %319 = vmatprep.mubr.f32.mxu1 %v804_v0  ;;  %69 = vperm.xlu1 %774, %v47_v11  }
  0x1e   :  { %74 = vperm.xlu0 %773, %v48_v13  }
  0x1f   :  { %708 = vmatmul.mubr.msk.f32.gmra.mrb[4].mxu0 %vm96_vm1, %v36_v12 }
  0x20   :  { %718 = vmatmul.mubr.msk.f32.gmra.mrb[4].mxu1 %vm96_vm1, %v36_v12  ;;  %212 = vmatprep.mubr.f32.mxu0 %v804_v0 }
  0x21   :  { %325 = vmatprep.mubr.f32.mxu1 %v804_v0  ;;  %79 = vperm.xlu1 %774, %v49_v14  }
  0x22   :  { %84 = vperm.xlu0 %773, %v50_v16  }
  0x23   :  { %709 = vmatmul.mubr.msk.f32.gmra.mrb[6].mxu0 %vm96_vm1, %v37_v15 }
  0x24   :  { %719 = vmatmul.mubr.msk.f32.gmra.mrb[6].mxu1 %vm96_vm1, %v37_v15  ;;  %218 = vmatprep.mubr.f32.mxu0 %v804_v0 }
  0x25   :  { %331 = vmatprep.mubr.f32.mxu1 %v804_v0  ;;  %89 = vperm.xlu1 %774, %v51_v17  }
  0x26   :  { %402 = vperm.xlu0 %773, %v394_v19  }
  0x27   :  { %710 = vmatmul.mubr.msk.f32.gmra.mrb[8].mxu0 %vm96_vm1, %v38_v18 }
  0x28   :  { %720 = vmatmul.mubr.msk.f32.gmra.mrb[8].mxu1 %vm96_vm1, %v38_v18  ;;  %224 = vmatprep.mubr.f32.mxu0 %v804_v0 }
  0x29   :  { %337 = vmatprep.mubr.f32.mxu1 %v804_v0  ;;  %407 = vperm.xlu1 %774, %v395_v20  }
  0x2a   :  { %412 = vperm.xlu0 %773, %v396_v22  }
  0x2b   :  { %711 = vmatmul.mubr.msk.f32.gmra.mrb[10].mxu0 %vm96_vm1, %v39_v21 }
  0x2c   :  { %721 = vmatmul.mubr.msk.f32.gmra.mrb[10].mxu1 %vm96_vm1, %v39_v21  ;;  %230 = vmatprep.mubr.f32.mxu0 %v804_v0 }
  0x2d   :  { %343 = vmatprep.mubr.f32.mxu1 %v804_v0  ;;  %417 = vperm.xlu1 %774, %v397_v23  }
  0x2e   :  { %422 = vperm.xlu0 %773, %v398_v25  }
  0x2f   :  { %712 = vmatmul.mubr.msk.f32.gmra.mrb[12].mxu0 %vm96_vm1, %v40_v24 }
  0x30   :  { %722 = vmatmul.mubr.msk.f32.gmra.mrb[12].mxu1 %vm96_vm1, %v40_v24  ;;  %236 = vmatprep.mubr.f32.mxu0 %v804_v0 }
  0x31   :  { %349 = vmatprep.mubr.f32.mxu1 %v804_v0  ;;  %427 = vperm.xlu1 %774, %v399_v26  }
  0x33   :  { %713 = vmatmul.mubr.msk.f32.gmra.mrb[14].mxu0 %vm96_vm1, %v41_v27 }
  0x34   :  { %723 = vmatmul.mubr.msk.f32.gmra.mrb[14].mxu1 %vm96_vm1, %v41_v27  ;;  %513 = vmatprep.mubr.f32.mxu0 %v804_v0 }
  0x35   :  { %614 = vmatprep.mubr.f32.mxu1 %v804_v0 }
  0x94   :  { %v55_v28 = vpop.permute.xlu0 %54 }
  0x98   :  { %v65_v34 = vpop.permute.xlu1 %64 }
  0x99   :  { %v60_v33 = vpop.permute.xlu0 %59 }
  0x9c   :  { %v70_v63 = vpop.permute.xlu1 %69 }
  0x9d   :  { %v75_v27 = vpop.permute.xlu0 %74 }
  0xea   :  { %v196_v29 = vpop.f32.mrb[0].mxu0 }
  0xeb   :  { %v309_v30 = vpop.f32.mrb[0].mxu1  ;;  %v198_v31 = vpop.f32.mrb[1].mxu0  ;;  %v197_v35 = vadd.f32 %v196_v29, %v55_v28 }
  0xec   :  { %v311_v32 = vpop.f32.mrb[1].mxu1  ;;  %v310_v36 = vadd.f32 %v309_v30, %v55_v28  ;;  %v199_v37 = vadd.f32 %v198_v31, %v55_v28  ;;  %v80_v30 = vpop.permute.xlu1 %79 }
  0xed   :  { %v312_v38 = vadd.f32 %v311_v32, %v55_v28  ;;  %v356_v47 = vmax.f32 %v197_v35, 0.0 }
  0xee   :  { %v202_v39 = vpop.f32.mrb[2].mxu0  ;;  %v358_v48 = vmax.f32 %v310_v36, 0.0  ;;  %v357_v51 = vmax.f32 %v199_v37, 0.0 }
  0xef   :  { %v315_v40 = vpop.f32.mrb[2].mxu1  ;;  %v203_v41 = vadd.f32 %v202_v39, %v60_v33  ;;  %v204_v43 = vpop.f32.mrb[3].mxu0  ;;  %v359_v52 = vmax.f32 %v312_v38, 0.0 }
  0xf0   :  { %v316_v42 = vadd.f32 %v315_v40, %v60_v33  ;;  %v317_v44 = vpop.f32.mrb[3].mxu1  ;;  %v205_v45 = vadd.f32 %v204_v43, %v60_v33 }
  0xf1   :  { %v318_v46 = vadd.f32 %v317_v44, %v60_v33  ;;  %v360_v49 = vmax.f32 %v203_v41, 0.0 }
  0xf2   :  { %v362_v50 = vmax.f32 %v316_v42, 0.0  ;;  %v361_v53 = vmax.f32 %v205_v45, 0.0  ;;  %v208_v55 = vpop.f32.mrb[4].mxu0 }
  0xf3   :  { %v363_v54 = vmax.f32 %v318_v46, 0.0  ;;  %v321_v56 = vpop.f32.mrb[4].mxu1  ;;  %v738_v57 = vpack.c.bf16 %v360_v49, %v356_v47  ;;  %v210_v59 = vpop.f32.mrb[5].mxu0  ;;  %v209_v1 = vadd.f32 %v208_v55, %v65_v34 }
  0xf4   :  { %v754_v58 = vpack.c.bf16 %v362_v50, %v358_v48  ;;  %v323_v60 = vpop.f32.mrb[5].mxu1  ;;  %v736_v61 = vpack.c.bf16 %v361_v53, %v357_v51  ;;  %v322_v2 = vadd.f32 %v321_v56, %v65_v34  ;;  %v211_v3 = vadd.f32 %v210_v59, %v65_v34 }
  0xf5   :  { %v752_v62 = vpack.c.bf16 %v363_v54, %v359_v52  ;;  %v324_v4 = vadd.f32 %v323_v60, %v65_v34  ;;  %v364_v13 = vmax.f32 %v209_v1, 0.0  ;;  %v90_v60 = vpop.permute.xlu1 %89 }
  0xf6   :  { %v214_v5 = vpop.f32.mrb[6].mxu0  ;;  %737 = vmatprep.subr.bf16.mxu0 %v736_v61  ;;  %v366_v14 = vmax.f32 %v322_v2, 0.0  ;;  %v365_v17 = vmax.f32 %v211_v3, 0.0 }
  0xf7   :  { %v327_v6 = vpop.f32.mrb[6].mxu1  ;;  %753 = vmatprep.subr.bf16.mxu1 %v752_v62  ;;  %v215_v7 = vadd.f32 %v214_v5, %v70_v63  ;;  %v216_v9 = vpop.f32.mrb[7].mxu0  ;;  %739 = vmatpush1.bf16.msra.mxu0 %v738_v57  ;;  %v367_v18 = vmax.f32 %v324_v4, 0.0 }
  0xf8   :  { %v328_v8 = vadd.f32 %v327_v6, %v70_v63  ;;  %v329_v10 = vpop.f32.mrb[7].mxu1  ;;  %755 = vmatpush1.bf16.msra.mxu1 %v754_v58  ;;  %v217_v11 = vadd.f32 %v216_v9, %v70_v63  ;;  %v85_v57 = vpop.permute.xlu0 %84 }
  0xf9   :  { %v330_v12 = vadd.f32 %v329_v10, %v70_v63  ;;  %v368_v15 = vmax.f32 %v215_v7, 0.0 }
  0xfa   :  { %v370_v16 = vmax.f32 %v328_v8, 0.0  ;;  %v369_v19 = vmax.f32 %v217_v11, 0.0  ;;  %v220_v21 = vpop.f32.mrb[8].mxu0 }
  0xfb   :  { %v371_v20 = vmax.f32 %v330_v12, 0.0  ;;  %v333_v22 = vpop.f32.mrb[8].mxu1  ;;  %v742_v23 = vpack.c.bf16 %v368_v15, %v364_v13  ;;  %v222_v25 = vpop.f32.mrb[9].mxu0  ;;  %v221_v31 = vadd.f32 %v220_v21, %v75_v27 }
  0xfc   :  { %v758_v24 = vpack.c.bf16 %v370_v16, %v366_v14  ;;  %v335_v26 = vpop.f32.mrb[9].mxu1  ;;  %v740_v28 = vpack.c.bf16 %v369_v19, %v365_v17  ;;  %v334_v32 = vadd.f32 %v333_v22, %v75_v27  ;;  %v223_v33 = vadd.f32 %v222_v25, %v75_v27  ;;  %v388_v22 = vld [vmem:[#allocation2] sm:$0xff]  ;;  %v391_v25 = vld [vmem:[#allocation2 + $0x18] sm:$0xff] }
  0xfd   :  { %v756_v29 = vpack.c.bf16 %v371_v20, %v367_v18  ;;  %v336_v34 = vadd.f32 %v335_v26, %v75_v27  ;;  %v372_v43 = vmax.f32 %v221_v31, 0.0  ;;  %v392_v26 = vld [vmem:[#allocation2 + $0x20] sm:$0xff]  ;;  %v393_v27 = vld [vmem:[#allocation2 + $0x28] sm:$0xff] }
  0xfe   :  { %v226_v35 = vpop.f32.mrb[10].mxu0  ;;  %741 = vmatprep.subr.bf16.mxu0 %v740_v28  ;;  %v374_v44 = vmax.f32 %v334_v32, 0.0  ;;  %v373_v47 = vmax.f32 %v223_v33, 0.0  ;;  %v403_v28 = vpop.permute.xlu0 %402 }
  0xff   :  { %v339_v36 = vpop.f32.mrb[10].mxu1  ;;  %757 = vmatprep.subr.bf16.mxu1 %v756_v29  ;;  %v227_v37 = vadd.f32 %v226_v35, %v80_v30  ;;  %v228_v39 = vpop.f32.mrb[11].mxu0  ;;  %743 = vmatpush1.bf16.msra.mxu0 %v742_v23  ;;  %v375_v48 = vmax.f32 %v336_v34, 0.0  ;;  %v389_v23 = vld [vmem:[#allocation2 + $0x8] sm:$0xff] }
 0x100   :  { %v340_v38 = vadd.f32 %v339_v36, %v80_v30  ;;  %v341_v40 = vpop.f32.mrb[11].mxu1  ;;  %759 = vmatpush1.bf16.msra.mxu1 %v758_v24  ;;  %v229_v41 = vadd.f32 %v228_v39, %v80_v30  ;;  %v390_v24 = vld [vmem:[#allocation2 + $0x10] sm:$0xff] }
 0x101   :  { %v342_v42 = vadd.f32 %v341_v40, %v80_v30  ;;  %v376_v45 = vmax.f32 %v227_v37, 0.0  ;;  %v408_v37 = vpop.permute.xlu1 %407 }
 0x102   :  { %v378_v46 = vmax.f32 %v340_v38, 0.0  ;;  %v377_v49 = vmax.f32 %v229_v41, 0.0  ;;  %v232_v51 = vpop.f32.mrb[12].mxu0 }
 0x103   :  { %v379_v50 = vmax.f32 %v342_v42, 0.0  ;;  %v345_v52 = vpop.f32.mrb[12].mxu1  ;;  %v746_v53 = vpack.c.bf16 %v376_v45, %v372_v43  ;;  %v234_v55 = vpop.f32.mrb[13].mxu0  ;;  %v233_v61 = vadd.f32 %v232_v51, %v85_v57 }
 0x104   :  { %v762_v54 = vpack.c.bf16 %v378_v46, %v374_v44  ;;  %v347_v56 = vpop.f32.mrb[13].mxu1  ;;  %v744_v58 = vpack.c.bf16 %v377_v49, %v373_v47  ;;  %v346_v62 = vadd.f32 %v345_v52, %v85_v57  ;;  %v235_v63 = vadd.f32 %v234_v55, %v85_v57  ;;  %v413_v49 = vpop.permute.xlu0 %412 }
 0x105   :  { %v760_v59 = vpack.c.bf16 %v379_v50, %v375_v48  ;;  %v348_v1 = vadd.f32 %v347_v56, %v85_v57  ;;  %v380_v10 = vmax.f32 %v233_v61, 0.0 }
 0x106   :  { %v238_v2 = vpop.f32.mrb[14].mxu0  ;;  %745 = vmatprep.subr.bf16.mxu0 %v744_v58  ;;  %v382_v11 = vmax.f32 %v346_v62, 0.0  ;;  %v381_v14 = vmax.f32 %v235_v63, 0.0  ;;  %v418_v62 = vpop.permute.xlu1 %417 }
 0x107   :  { %v351_v3 = vpop.f32.mrb[14].mxu1  ;;  %761 = vmatprep.subr.bf16.mxu1 %v760_v59  ;;  %v239_v4 = vadd.f32 %v238_v2, %v90_v60  ;;  %v240_v6 = vpop.f32.mrb[15].mxu0  ;;  %747 = vmatpush1.bf16.msra.mxu0 %v746_v53  ;;  %v383_v15 = vmax.f32 %v348_v1, 0.0 }
 0x108   :  { %v352_v5 = vadd.f32 %v351_v3, %v90_v60  ;;  %v353_v7 = vpop.f32.mrb[15].mxu1  ;;  %763 = vmatpush1.bf16.msra.mxu1 %v762_v54  ;;  %v241_v8 = vadd.f32 %v240_v6, %v90_v60 }
 0x109   :  { %v354_v9 = vadd.f32 %v353_v7, %v90_v60  ;;  %v384_v12 = vmax.f32 %v239_v4, 0.0 }
 0x10a   :  { %v386_v13 = vmax.f32 %v352_v5, 0.0  ;;  %v385_v16 = vmax.f32 %v241_v8, 0.0 }
 0x10b   :  { %v387_v17 = vmax.f32 %v354_v9, 0.0  ;;  %v750_v18 = vpack.c.bf16 %v384_v12, %v380_v10  ;;  %v423_v12 = vpop.permute.xlu0 %422 }
 0x10c   :  { %v766_v19 = vpack.c.bf16 %v386_v13, %v382_v11  ;;  %v748_v20 = vpack.c.bf16 %v385_v16, %v381_v14 }
 0x10d   :  { %v764_v21 = vpack.c.bf16 %v387_v17, %v383_v15 }
 0x10e   :  { %749 = vmatprep.subr.bf16.mxu0 %v748_v20 }
 0x10f   :  { %765 = vmatprep.subr.bf16.mxu1 %v764_v21  ;;  %751 = vmatpush1.bf16.msra.mxu0 %v750_v18 }
 0x110   :  { %767 = vmatpush1.bf16.msra.mxu1 %v766_v19 }
 0x112   :  { %724 = vmatmul.mubr.msk.f32.vlgmr.msra.gmra.mrb[16].mxu0 %vm430_vm2, %v388_v22 }
 0x113   :  { %730 = vmatmul.mubr.msk.f32.vlgmr.msra.gmra.mrb[16].mxu1 %vm430_vm2, %v388_v22  ;;  %519 = vmatprep.mubr.f32.mxu0 %v804_v0 }
 0x114   :  { %620 = vmatprep.mubr.f32.mxu1 %v804_v0 }
 0x116   :  { %725 = vmatmul.mubr.msk.f32.gmra.mrb[18].mxu0 %vm430_vm2, %v389_v23 }
 0x117   :  { %731 = vmatmul.mubr.msk.f32.gmra.mrb[18].mxu1 %vm430_vm2, %v389_v23  ;;  %525 = vmatprep.mubr.f32.mxu0 %v804_v0 }
 0x118   :  { %626 = vmatprep.mubr.f32.mxu1 %v804_v0 }
 0x11a   :  { %726 = vmatmul.mubr.msk.f32.gmra.mrb[20].mxu0 %vm430_vm2, %v390_v24 }
 0x11b   :  { %732 = vmatmul.mubr.msk.f32.gmra.mrb[20].mxu1 %vm430_vm2, %v390_v24  ;;  %531 = vmatprep.mubr.f32.mxu0 %v804_v0 }
 0x11c   :  { %632 = vmatprep.mubr.f32.mxu1 %v804_v0 }
 0x11e   :  { %727 = vmatmul.mubr.msk.f32.gmra.mrb[22].mxu0 %vm430_vm2, %v391_v25 }
 0x11f   :  { %733 = vmatmul.mubr.msk.f32.gmra.mrb[22].mxu1 %vm430_vm2, %v391_v25  ;;  %537 = vmatprep.mubr.f32.mxu0 %v804_v0  ;;  %v428_v25 = vpop.permute.xlu1 %427 }
 0x120   :  { %638 = vmatprep.mubr.f32.mxu1 %v804_v0 }
 0x122   :  { %728 = vmatmul.mubr.msk.f32.gmra.mrb[24].mxu0 %vm430_vm2, %v392_v26 }
 0x123   :  { %734 = vmatmul.mubr.msk.f32.gmra.mrb[24].mxu1 %vm430_vm2, %v392_v26  ;;  %543 = vmatprep.mubr.f32.mxu0 %v804_v0 }
 0x124   :  { %644 = vmatprep.mubr.f32.mxu1 %v804_v0 }
 0x126   :  { %729 = vmatmul.mubr.msk.f32.gmra.mrb[26].mxu0 %vm430_vm2, %v393_v27 }
 0x127   :  { %735 = vmatmul.mubr.msk.f32.gmra.mrb[26].mxu1 %vm430_vm2, %v393_v27 }
 0x1e5   :  { %v515_v29 = vpop.f32.mrb[16].mxu0 }
 0x1e6   :  { %v616_v30 = vpop.f32.mrb[16].mxu1  ;;  %v516_v31 = vadd.f32 %v515_v29, %v403_v28  ;;  %v517_v33 = vpop.f32.mrb[17].mxu0 }
 0x1e7   :  { %v617_v32 = vadd.f32 %v616_v30, %v403_v28  ;;  %v618_v34 = vpop.f32.mrb[17].mxu1  ;;  %v518_v35 = vadd.f32 %v517_v33, %v403_v28 }
 0x1e8   :  { %v619_v36 = vadd.f32 %v618_v34, %v403_v28  ;;  %v651_v38 = vmax.f32 %v516_v31, 0.0 }
 0x1e9   :  { %v653_v39 = vmax.f32 %v617_v32, 0.0  ;;  %v652_v40 = vmax.f32 %v518_v35, 0.0  ;;  %v521_v0 = vpop.f32.mrb[18].mxu0 }
 0x1ea   :  { %v654_v41 = vmax.f32 %v619_v36, 0.0  ;;  %v622_v42 = vpop.f32.mrb[18].mxu1  ;;  %675 = vst [vmem:[%s1053_s5] sm:$0xff] %v651_v38  ;;  %v522_v43 = vadd.f32 %v521_v0, %v408_v37  ;;  %v523_v45 = vpop.f32.mrb[19].mxu0 }
 0x1eb   :  { %677 = vst [vmem:[%s1053_s5 + $0x10] sm:$0xff] %v653_v39  ;;  %v623_v44 = vadd.f32 %v622_v42, %v408_v37  ;;  %v624_v46 = vpop.f32.mrb[19].mxu1  ;;  %676 = vst [vmem:[%s1053_s5 + $0x8] sm:$0xff] %v652_v40  ;;  %v524_v47 = vadd.f32 %v523_v45, %v408_v37 }
 0x1ec   :  { %678 = vst [vmem:[%s1053_s5 + $0x18] sm:$0xff] %v654_v41  ;;  %v625_v48 = vadd.f32 %v624_v46, %v408_v37  ;;  %v655_v50 = vmax.f32 %v522_v43, 0.0 }
 0x1ed   :  { %v657_v51 = vmax.f32 %v623_v44, 0.0  ;;  %v656_v52 = vmax.f32 %v524_v47, 0.0  ;;  %v527_v54 = vpop.f32.mrb[20].mxu0 }
 0x1ee   :  { %v658_v53 = vmax.f32 %v625_v48, 0.0  ;;  %v628_v55 = vpop.f32.mrb[20].mxu1  ;;  %679 = vst [vmem:[%s1053_s5 + $0x20] sm:$0xff] %v655_v50  ;;  %v528_v56 = vadd.f32 %v527_v54, %v413_v49  ;;  %v529_v58 = vpop.f32.mrb[21].mxu0 }
 0x1ef   :  { %681 = vst [vmem:[%s1053_s5 + $0x30] sm:$0xff] %v657_v51  ;;  %v629_v57 = vadd.f32 %v628_v55, %v413_v49  ;;  %v630_v59 = vpop.f32.mrb[21].mxu1  ;;  %680 = vst [vmem:[%s1053_s5 + $0x28] sm:$0xff] %v656_v52  ;;  %v530_v60 = vadd.f32 %v529_v58, %v413_v49 }
 0x1f0   :  { %682 = vst [vmem:[%s1053_s5 + $0x38] sm:$0xff] %v658_v53  ;;  %v631_v61 = vadd.f32 %v630_v59, %v413_v49  ;;  %v659_v63 = vmax.f32 %v528_v56, 0.0 }
 0x1f1   :  { %v661_v1 = vmax.f32 %v629_v57, 0.0  ;;  %v660_v2 = vmax.f32 %v530_v60, 0.0  ;;  %v533_v4 = vpop.f32.mrb[22].mxu0 }
 0x1f2   :  { %v662_v3 = vmax.f32 %v631_v61, 0.0  ;;  %v634_v5 = vpop.f32.mrb[22].mxu1  ;;  %683 = vst [vmem:[%s1053_s5 + $0x40] sm:$0xff] %v659_v63  ;;  %v534_v6 = vadd.f32 %v533_v4, %v418_v62  ;;  %v535_v8 = vpop.f32.mrb[23].mxu0 }
 0x1f3   :  { %685 = vst [vmem:[%s1053_s5 + $0x50] sm:$0xff] %v661_v1  ;;  %v635_v7 = vadd.f32 %v634_v5, %v418_v62  ;;  %v636_v9 = vpop.f32.mrb[23].mxu1  ;;  %684 = vst [vmem:[%s1053_s5 + $0x48] sm:$0xff] %v660_v2  ;;  %v536_v10 = vadd.f32 %v535_v8, %v418_v62 }
 0x1f4   :  { %686 = vst [vmem:[%s1053_s5 + $0x58] sm:$0xff] %v662_v3  ;;  %v637_v11 = vadd.f32 %v636_v9, %v418_v62  ;;  %v663_v13 = vmax.f32 %v534_v6, 0.0 }
 0x1f5   :  { %v665_v14 = vmax.f32 %v635_v7, 0.0  ;;  %v664_v15 = vmax.f32 %v536_v10, 0.0  ;;  %v539_v17 = vpop.f32.mrb[24].mxu0 }
 0x1f6   :  { %v666_v16 = vmax.f32 %v637_v11, 0.0  ;;  %v640_v18 = vpop.f32.mrb[24].mxu1  ;;  %687 = vst [vmem:[%s1053_s5 + $0x60] sm:$0xff] %v663_v13  ;;  %v540_v19 = vadd.f32 %v539_v17, %v423_v12  ;;  %v541_v21 = vpop.f32.mrb[25].mxu0 }
 0x1f7   :  { %689 = vst [vmem:[%s1053_s5 + $0x70] sm:$0xff] %v665_v14  ;;  %v641_v20 = vadd.f32 %v640_v18, %v423_v12  ;;  %v642_v22 = vpop.f32.mrb[25].mxu1  ;;  %688 = vst [vmem:[%s1053_s5 + $0x68] sm:$0xff] %v664_v15  ;;  %v542_v23 = vadd.f32 %v541_v21, %v423_v12 }
 0x1f8   :  { %690 = vst [vmem:[%s1053_s5 + $0x78] sm:$0xff] %v666_v16  ;;  %v643_v24 = vadd.f32 %v642_v22, %v423_v12  ;;  %v667_v26 = vmax.f32 %v540_v19, 0.0 }
 0x1f9   :  { %v669_v27 = vmax.f32 %v641_v20, 0.0  ;;  %v668_v28 = vmax.f32 %v542_v23, 0.0  ;;  %v545_v30 = vpop.f32.mrb[26].mxu0 }
 0x1fa   :  { %v670_v29 = vmax.f32 %v643_v24, 0.0  ;;  %v646_v31 = vpop.f32.mrb[26].mxu1  ;;  %691 = vst [vmem:[%s1053_s5 + $0x80] sm:$0xff] %v667_v26  ;;  %v546_v32 = vadd.f32 %v545_v30, %v428_v25  ;;  %v547_v34 = vpop.f32.mrb[27].mxu0 }
 0x1fb   :  { %693 = vst [vmem:[%s1053_s5 + $0x90] sm:$0xff] %v669_v27  ;;  %v647_v33 = vadd.f32 %v646_v31, %v428_v25  ;;  %v648_v35 = vpop.f32.mrb[27].mxu1  ;;  %692 = vst [vmem:[%s1053_s5 + $0x88] sm:$0xff] %v668_v28  ;;  %v548_v36 = vadd.f32 %v547_v34, %v428_v25 }
 0x1fc   :  { %694 = vst [vmem:[%s1053_s5 + $0x98] sm:$0xff] %v670_v29  ;;  %v649_v37 = vadd.f32 %v648_v35, %v428_v25  ;;  %v671_v38 = vmax.f32 %v546_v32, 0.0 }
 0x1fd   :  { %v673_v39 = vmax.f32 %v647_v33, 0.0  ;;  %v672_v40 = vmax.f32 %v548_v36, 0.0 }
 0x1fe   :  { %v674_v41 = vmax.f32 %v649_v37, 0.0  ;;  %695 = vst [vmem:[%s1053_s5 + $0xa0] sm:$0xff] %v671_v38 }
 0x1ff   :  { %697 = vst [vmem:[%s1053_s5 + $0xb0] sm:$0xff] %v673_v39  ;;  %696 = vst [vmem:[%s1053_s5 + $0xa8] sm:$0xff] %v672_v40 }
 0x200   :  { %698 = vst [vmem:[%s1053_s5 + $0xb8] sm:$0xff] %v674_v41 }
 0x201   :  { %703 = vsyncpa [#allocation3], 1 }

</bundles_post_ra>
